<compile_context>
chip_gen: v7x
topology: tpu7x:2x2x1
jax: 0.10.0
libtpu: 0.0.40
codegen_flags: <defaults>
</compile_context>

<pallas_src>
import jax
import jax.numpy as jnp
from jax.experimental import pallas as pl
from jax.experimental.pallas import tpu as pltpu

H1, H2, H3 = 64, 96, 64          # logical hidden widths (match the PyTorch module)
H2_PAD = 128                     # 96 padded to a full lane width
SUBLANE_PACK = 16                # bf16 packs 2 rows per sublane -> 16-row tiles
MAX_TB = 4096                    # large-batch tile cap (~few MB VMEM working set)


def _round_up(n: int, m: int) -> int:
    return ((n + m - 1) // m) * m


def mlp_kernel(x_ref,
               w1_ref, b1_ref,
               w2_ref, b2_ref,
               w3_ref, b3_ref,
               w4_ref, b4_ref,
               out_ref):
    # x arrives f32; cast to bf16 in-kernel (rides in spare VPU slots).
    x = x_ref[...].astype(jnp.bfloat16)                                # (TB, in_dim)

    h1 = jnp.dot(x, w1_ref[...], preferred_element_type=jnp.float32) + b1_ref[...]
    h1 = jnp.tanh(h1).astype(jnp.bfloat16)                             # (TB, 64)

    h2 = jnp.dot(h1, w2_ref[...], preferred_element_type=jnp.float32) + b2_ref[...]
    h2 = jnp.tanh(h2).astype(jnp.bfloat16)                             # (TB, 128) (96 padded)

    h3 = jnp.dot(h2, w3_ref[...], preferred_element_type=jnp.float32) + b3_ref[...]
    h3 = jnp.tanh(h3)                                                  # (TB, 64) f32

    # Final layer in f32 (Q-value precision for argmax over actions).
    out = jnp.dot(h3, w4_ref[...], preferred_element_type=jnp.float32) + b4_ref[...]
    out_ref[...] = out                                                 # (TB, out_dim) f32


def prepare_params(params):
    """One-time padding + bf16 casting of the weights (cache the result)."""
    (w1, b1), (w2, b2), (w3, b3), (w4, b4) = params
    w2p = jnp.pad(w2, ((0, 0), (0, H2_PAD - H2)))
    b2p = jnp.pad(b2, ((0, 0), (0, H2_PAD - H2)))
    w3p = jnp.pad(w3, ((0, H2_PAD - H2), (0, 0)))
    return (
        w1.astype(jnp.bfloat16), b1,
        w2p.astype(jnp.bfloat16), b2p,
        w3p.astype(jnp.bfloat16), b3,
        w4, b4,                       # final layer stays f32
    )


@jax.jit
def neural_network_forward(x, prepared):
    """x: (batch, input_dim) f32, prepared = prepare_params(params).
    Returns (batch, output_dim) f32."""
    w1b, b1, w2b, b2p, w3b, b3, w4, b4 = prepared
    batch, in_dim = x.shape
    out_dim = w4.shape[1]

    # ---- batch tiling ----
    # Small batch (DQN action selection): single tile, padded to the native
    # bf16 16-row sublane pack.  Large batch: big tiles to amortize the
    # ~0.35us/grid-step overhead, but keep grid >= 2 so both v7x TCs get work.
    if batch <= 512:
        TB = _round_up(batch, SUBLANE_PACK)
    else:
        TB = min(_round_up(pl.cdiv(batch, 2), 512), MAX_TB)
    padded_batch = _round_up(batch, TB)
    xp = jnp.pad(x, ((0, padded_batch - batch), (0, 0)))               # stays f32
    grid = (padded_batch // TB,)

    const = lambda i: (0, 0)                 # weights/biases: resident across grid
    in_specs = [
        pl.BlockSpec((TB, in_dim), lambda i: (i, 0)),     # x tile
        pl.BlockSpec(w1b.shape, const), pl.BlockSpec(b1.shape, const),
        pl.BlockSpec(w2b.shape, const), pl.BlockSpec(b2p.shape, const),
        pl.BlockSpec(w3b.shape, const), pl.BlockSpec(b3.shape, const),
        pl.BlockSpec(w4.shape, const), pl.BlockSpec(b4.shape, const),
    ]
    # Output block last dim == full array dim (out_dim) -> legal and avoids
    # any lane padding of the writeback.
    out_specs = pl.BlockSpec((TB, out_dim), lambda i: (i, 0))

    flops = 2 * padded_batch * (in_dim * H1 + H1 * H2_PAD + H2_PAD * H3 + H3 * out_dim)
    transcendentals = padded_batch * (H1 + H2_PAD + H3)
    weight_bytes = sum(int(a.size) * a.dtype.itemsize
                       for a in (w1b, b1, w2b, b2p, w3b, b3, w4, b4))
    bytes_accessed = int(xp.size) * 4 + padded_batch * out_dim * 4 + weight_bytes

    out_padded = pl.pallas_call(
        mlp_kernel,
        out_shape=jax.ShapeDtypeStruct((padded_batch, out_dim), jnp.float32),
        grid=grid,
        in_specs=in_specs,
        out_specs=out_specs,
        compiler_params=pltpu.CompilerParams(
            dimension_semantics=("parallel",),
            vmem_limit_bytes=32 * 1024 * 1024,
        ),
        cost_estimate=pl.CostEstimate(
            flops=flops,
            transcendentals=transcendentals,
            bytes_accessed=bytes_accessed,
        ),
    )(xp, w1b, b1, w2b, b2p, w3b, b3, w4, b4)

    return out_padded[:batch, :]


# ---------------------------------------------------------------------------
# Parameter init (PyTorch Linear-style U(-1/sqrt(fan_in), 1/sqrt(fan_in))).
# Weights stored transposed vs PyTorch: (in_features, out_features).
# ---------------------------------------------------------------------------
def init_linear_params(key, in_features, out_features):
    kw, kb = jax.random.split(key)
    bound = 1.0 / jnp.sqrt(jnp.float32(in_features))
    w = jax.random.uniform(kw, (in_features, out_features), jnp.float32,
                           minval=-bound, maxval=bound)
    b = jax.random.uniform(kb, (1, out_features), jnp.float32,
                           minval=-bound, maxval=bound)
    return w, b


def init_network_params(key, input_dimension, output_dimension):
    k1, k2, k3, k4 = jax.random.split(key, 4)
    return (
        init_linear_params(k1, input_dimension, 64),
        init_linear_params(k2, 64, 96),
        init_linear_params(k3, 96, 64),
        init_linear_params(k4, 64, output_dimension),
    )


def reference_forward(x, params):
    (w1, b1), (w2, b2), (w3, b3), (w4, b4) = params
    h1 = jnp.tanh(x @ w1 + b1)
    h2 = jnp.tanh(h1 @ w2 + b2)
    h3 = jnp.tanh(h2 @ w3 + b3)
    return h3 @ w4 + b4


if __name__ == "__main__":
    input_dimension = 8    # DQN state dimension
    output_dimension = 4   # number of discrete actions

    key = jax.random.PRNGKey(0)
    kx, kp, kx2 = jax.random.split(key, 3)
    params = init_network_params(kp, input_dimension, output_dimension)
    prepared = jax.tree_util.tree_map(jax.block_until_ready, prepare_params(params))

    # --- small-batch check (the DQN action-selection case) ---
    batch = 2
    x = jax.random.normal(kx, (batch, input_dimension), jnp.float32)
    out = jax.block_until_ready(neural_network_forward(x, prepared))
    ref = reference_forward(x, params)
    assert out.shape == (batch, output_dimension)
    assert jnp.allclose(out, ref, atol=5e-2, rtol=5e-2), "mismatch vs reference (batch=2)"

    # --- larger-batch check to exercise the tiled / 2-TC parallel grid path ---
    big_batch = 1024
    xb = jax.random.normal(kx2, (big_batch, input_dimension), jnp.float32)
    out_b = jax.block_until_ready(neural_network_forward(xb, prepared))
    ref_b = reference_forward(xb, params)
    assert out_b.shape == (big_batch, output_dimension)
    assert jnp.allclose(out_b, ref_b, atol=5e-2, rtol=5e-2), "mismatch vs reference (batch=1024)"

    print("KERNEL_OK")
</pallas_src>

<mosaic_0001>
module attributes {stable_mosaic.version = 11 : i64} {
  func.func @mlp_kernel(%arg0: i32, %arg1: memref<16x8xf32, #tpu.memory_space<vmem>>, %arg2: memref<8x64xbf16, #tpu.memory_space<vmem>>, %arg3: memref<1x64xf32, #tpu.memory_space<vmem>>, %arg4: memref<64x128xbf16, #tpu.memory_space<vmem>>, %arg5: memref<1x128xf32, #tpu.memory_space<vmem>>, %arg6: memref<128x64xbf16, #tpu.memory_space<vmem>>, %arg7: memref<1x64xf32, #tpu.memory_space<vmem>>, %arg8: memref<64x4xf32, #tpu.memory_space<vmem>>, %arg9: memref<1x4xf32, #tpu.memory_space<vmem>>, %arg10: memref<16x4xf32, #tpu.memory_space<vmem>>) attributes {dimension_semantics = [#tpu.dimension_semantics<parallel>], iteration_bounds = array<i64: 1>, scalar_prefetch = 0 : i64, scratch_operands = 0 : i64, tpu.core_type = #tpu.core_type<tc>, window_params = [{transform_indices = @transform_0, window_bounds = array<i64: 16, 8>}, {pipeline_mode = #tpu.pipeline_mode<synchronous>, transform_indices = @transform_1, window_bounds = array<i64: 8, 64>}, {pipeline_mode = #tpu.pipeline_mode<synchronous>, transform_indices = @transform_2, window_bounds = array<i64: 1, 64>}, {pipeline_mode = #tpu.pipeline_mode<synchronous>, transform_indices = @transform_3, window_bounds = array<i64: 64, 128>}, {pipeline_mode = #tpu.pipeline_mode<synchronous>, transform_indices = @transform_4, window_bounds = array<i64: 1, 128>}, {pipeline_mode = #tpu.pipeline_mode<synchronous>, transform_indices = @transform_5, window_bounds = array<i64: 128, 64>}, {pipeline_mode = #tpu.pipeline_mode<synchronous>, transform_indices = @transform_6, window_bounds = array<i64: 1, 64>}, {pipeline_mode = #tpu.pipeline_mode<synchronous>, transform_indices = @transform_7, window_bounds = array<i64: 64, 4>}, {pipeline_mode = #tpu.pipeline_mode<synchronous>, transform_indices = @transform_8, window_bounds = array<i64: 1, 4>}, {transform_indices = @transform_9, window_bounds = array<i64: 16, 4>}]} {
    %c0 = arith.constant 0 : index
    %c0_0 = arith.constant 0 : index
    %0 = vector.load %arg1[%c0, %c0_0] : memref<16x8xf32, #tpu.memory_space<vmem>>, vector<16x8xf32>
    %1 = arith.truncf %0 : vector<16x8xf32> to vector<16x8xbf16>
    %c0_1 = arith.constant 0 : index
    %c0_2 = arith.constant 0 : index
    %2 = vector.load %arg2[%c0_1, %c0_2] : memref<8x64xbf16, #tpu.memory_space<vmem>>, vector<8x64xbf16>
    %cst = arith.constant dense<0.000000e+00> : vector<16x64xf32>
    %3 = tpu.matmul %1, %2, %cst {dimension_numbers = #tpu.dot_dimension_numbers<[1], [0], [0], [1], [0, 0, 1, 1], [], []>} : vector<16x8xbf16>, vector<8x64xbf16>, vector<16x64xf32> -> vector<16x64xf32>
    %c0_3 = arith.constant 0 : index
    %c0_4 = arith.constant 0 : index
    %4 = vector.load %arg3[%c0_3, %c0_4] : memref<1x64xf32, #tpu.memory_space<vmem>>, vector<1x64xf32>
    %5 = vector.broadcast %4 : vector<1x64xf32> to vector<16x64xf32>
    %6 = arith.addf %3, %5 : vector<16x64xf32>
    %7 = math.tanh %6 : vector<16x64xf32>
    %8 = arith.truncf %7 : vector<16x64xf32> to vector<16x64xbf16>
    %c0_5 = arith.constant 0 : index
    %c0_6 = arith.constant 0 : index
    %9 = vector.load %arg4[%c0_5, %c0_6] : memref<64x128xbf16, #tpu.memory_space<vmem>>, vector<64x128xbf16>
    %cst_7 = arith.constant dense<0.000000e+00> : vector<16x128xf32>
    %10 = tpu.matmul %8, %9, %cst_7 {dimension_numbers = #tpu.dot_dimension_numbers<[1], [0], [0], [1], [0, 0, 1, 1], [], []>} : vector<16x64xbf16>, vector<64x128xbf16>, vector<16x128xf32> -> vector<16x128xf32>
    %c0_8 = arith.constant 0 : index
    %c0_9 = arith.constant 0 : index
    %11 = vector.load %arg5[%c0_8, %c0_9] : memref<1x128xf32, #tpu.memory_space<vmem>>, vector<1x128xf32>
    %12 = vector.broadcast %11 : vector<1x128xf32> to vector<16x128xf32>
    %13 = arith.addf %10, %12 : vector<16x128xf32>
    %14 = math.tanh %13 : vector<16x128xf32>
    %15 = arith.truncf %14 : vector<16x128xf32> to vector<16x128xbf16>
    %c0_10 = arith.constant 0 : index
    %c0_11 = arith.constant 0 : index
    %16 = vector.load %arg6[%c0_10, %c0_11] : memref<128x64xbf16, #tpu.memory_space<vmem>>, vector<128x64xbf16>
    %cst_12 = arith.constant dense<0.000000e+00> : vector<16x64xf32>
    %17 = tpu.matmul %15, %16, %cst_12 {dimension_numbers = #tpu.dot_dimension_numbers<[1], [0], [0], [1], [0, 0, 1, 1], [], []>} : vector<16x128xbf16>, vector<128x64xbf16>, vector<16x64xf32> -> vector<16x64xf32>
    %c0_13 = arith.constant 0 : index
    %c0_14 = arith.constant 0 : index
    %18 = vector.load %arg7[%c0_13, %c0_14] : memref<1x64xf32, #tpu.memory_space<vmem>>, vector<1x64xf32>
    %19 = vector.broadcast %18 : vector<1x64xf32> to vector<16x64xf32>
    %20 = arith.addf %17, %19 : vector<16x64xf32>
    %21 = math.tanh %20 : vector<16x64xf32>
    %c0_15 = arith.constant 0 : index
    %c0_16 = arith.constant 0 : index
    %22 = vector.load %arg8[%c0_15, %c0_16] : memref<64x4xf32, #tpu.memory_space<vmem>>, vector<64x4xf32>
    %cst_17 = arith.constant dense<0.000000e+00> : vector<16x4xf32>
    %23 = tpu.matmul %21, %22, %cst_17 {dimension_numbers = #tpu.dot_dimension_numbers<[1], [0], [0], [1], [0, 0, 1, 1], [], []>} : vector<16x64xf32>, vector<64x4xf32>, vector<16x4xf32> -> vector<16x4xf32>
    %c0_18 = arith.constant 0 : index
    %c0_19 = arith.constant 0 : index
    %24 = vector.load %arg9[%c0_18, %c0_19] : memref<1x4xf32, #tpu.memory_space<vmem>>, vector<1x4xf32>
    %25 = vector.broadcast %24 : vector<1x4xf32> to vector<16x4xf32>
    %26 = arith.addf %23, %25 : vector<16x4xf32>
    %c0_20 = arith.constant 0 : index
    %c0_21 = arith.constant 0 : index
    %27 = vector.load %arg10[%c0_20, %c0_21] : memref<16x4xf32, #tpu.memory_space<vmem>>, vector<16x4xf32>
    tpu.vector_store %arg10[%c0_20, %c0_21], %26 {strides = array<i32>} : memref<16x4xf32, #tpu.memory_space<vmem>>, vector<16x4xf32>,
    return
  }
  func.func @transform_0(%arg0: i32) -> (i32, i32) {
    %c0_i32 = arith.constant 0 : i32
    %c0_i32_0 = arith.constant 0 : i32
    return %arg0, %c0_i32 : i32, i32
  }
  func.func @transform_1(%arg0: i32) -> (i32, i32) {
    %c0_i32 = arith.constant 0 : i32
    %c0_i32_0 = arith.constant 0 : i32
    %c0_i32_1 = arith.constant 0 : i32
    return %c0_i32, %c0_i32_0 : i32, i32
  }
  func.func @transform_2(%arg0: i32) -> (i32, i32) {
    %c0_i32 = arith.constant 0 : i32
    %c0_i32_0 = arith.constant 0 : i32
    %c0_i32_1 = arith.constant 0 : i32
    return %c0_i32, %c0_i32_0 : i32, i32
  }
  func.func @transform_3(%arg0: i32) -> (i32, i32) {
    %c0_i32 = arith.constant 0 : i32
    %c0_i32_0 = arith.constant 0 : i32
    %c0_i32_1 = arith.constant 0 : i32
    return %c0_i32, %c0_i32_0 : i32, i32
  }
  func.func @transform_4(%arg0: i32) -> (i32, i32) {
    %c0_i32 = arith.constant 0 : i32
    %c0_i32_0 = arith.constant 0 : i32
    %c0_i32_1 = arith.constant 0 : i32
    return %c0_i32, %c0_i32_0 : i32, i32
  }
  func.func @transform_5(%arg0: i32) -> (i32, i32) {
    %c0_i32 = arith.constant 0 : i32
    %c0_i32_0 = arith.constant 0 : i32
    %c0_i32_1 = arith.constant 0 : i32
    return %c0_i32, %c0_i32_0 : i32, i32
  }
  func.func @transform_6(%arg0: i32) -> (i32, i32) {
    %c0_i32 = arith.constant 0 : i32
    %c0_i32_0 = arith.constant 0 : i32
    %c0_i32_1 = arith.constant 0 : i32
    return %c0_i32, %c0_i32_0 : i32, i32
  }
  func.func @transform_7(%arg0: i32) -> (i32, i32) {
    %c0_i32 = arith.constant 0 : i32
    %c0_i32_0 = arith.constant 0 : i32
    %c0_i32_1 = arith.constant 0 : i32
    return %c0_i32, %c0_i32_0 : i32, i32
  }
  func.func @transform_8(%arg0: i32) -> (i32, i32) {
    %c0_i32 = arith.constant 0 : i32
    %c0_i32_0 = arith.constant 0 : i32
    %c0_i32_1 = arith.constant 0 : i32
    return %c0_i32, %c0_i32_0 : i32, i32
  }
  func.func @transform_9(%arg0: i32) -> (i32, i32) {
    %c0_i32 = arith.constant 0 : i32
    %c0_i32_0 = arith.constant 0 : i32
    return %arg0, %c0_i32 : i32, i32
  }
}

</mosaic_0001>

<bundles_post_ra>
// kernel: neural_network_forward.1
= control target key start
LH: loop header
LB: loop body
LE: loop exit
PB: predicated region body
PF: predicated region fallthrough
CT: control target
= control target key end

     0   :  { %vm48_vm0 = vcmask 1043456   ;;  %v545_v0 = vmov 0.0   ;;  %vm546_vm1 = vmmov 0   ;;  %vm44_vm2 = vcmask 64512   ;;  %s703_s1 = inlined_call_operand.vmem [shape: bf16[8,64], index: 1, kind: input, shape index: {}]   ;;  %s704_s0 = inlined_call_operand.vmem [shape: f32[16,8], index: 0, kind: input, shape index: {}]   ;;  %s705_s3 = inlined_call_operand.vmem [shape: bf16[64,128], index: 3, kind: input, shape index: {}]   ;;  %s706_s5 = inlined_call_operand.vmem [shape: bf16[128,64], index: 5, kind: input, shape index: {}]   ;;  %s707_s2 = inlined_call_operand.vmem [shape: f32[1,64], index: 2, kind: input, shape index: {}]   ;;  %s708_s4 = inlined_call_operand.vmem [shape: f32[1,128], index: 4, kind: input, shape index: {}]   ;;  %s709_s7 = inlined_call_operand.vmem [shape: f32[64,4], index: 7, kind: input, shape index: {}]   ;;  %s710_s6 = inlined_call_operand.vmem [shape: f32[1,64], index: 6, kind: input, shape index: {}]   ;;  %s711_s8 = inlined_call_operand.vmem [shape: f32[1,4], index: 8, kind: input, shape index: {}]   ;;  %s712_s9 = inlined_call_operand.vmem [shape: f32[16,4], index: 9, kind: output, shape index: {}]  }
   0x1   :  { %446 = vmatprep.subr.bf16.mxu1 %v545_v0  ;;  %v36_v1 = vld [vmem:[%s703_s1] sm:$0xf]  ;;  %448 = vmatprep.mubr.msk.bf16.mxu1 %vm546_vm1, %v545_v0  ;;  %v34_v3 = vld [vmem:[%s704_s0 + $0x8] sm:$0xff]  ;;  %v523_v8 = vld [vmem:[%s705_s3 + $0x10] sm:$0xff]   ;;  %vm135_vm3 = vcmask 523264   ;;  %vm393_vm4 = vcmask 31744  }
   0x2   :  { %v33_v2 = vld [vmem:[%s704_s0] sm:$0xff]  ;;  %v50_v4 = vsel %vm48_vm0, %v36_v1, 0  ;;  %464 = vmatprep.subr.bf16.mxu0 %v545_v0  ;;  %480 = vmatprep.mubr.msk.bf16.mxu0 %vm546_vm1, %v545_v0  ;;  %v522_v7 = vld [vmem:[%s705_s3 + $0x8] sm:$0xff]   ;;  %v524_v9 = vld [vmem:[%s705_s3 + $0x18] sm:$0xff]  }
   0x3   :  { %v35_v5 = vpack.c.bf16 %v34_v3, %v33_v2  ;;  %447 = vmatpush3.bf16.msra.mxu1 %v50_v4  ;;  %v521_v6 = vld [vmem:[%s705_s3] sm:$0xff]   ;;  %v526_v11 = vld [vmem:[%s706_s5 + $0x8] sm:$0xff]   ;;  %v527_v12 = vld [vmem:[%s706_s5 + $0x10] sm:$0xff]  }
   0x4   :  { %452 = vmatprep.subr.bf16.mxu1 %v545_v0  ;;  %v525_v10 = vld [vmem:[%s706_s5] sm:$0xff]   ;;  %v528_v13 = vld [vmem:[%s706_s5 + $0x18] sm:$0xff]   ;;  %v530_v25 = vld [vmem:[%s706_s5 + $0x28] sm:$0xff]  }
   0x5   :  { %465 = vmatpush3.bf16.msra.mxu0 %v525_v10  ;;  %v400_v14 = vld [vmem:[%s707_s2] ss:$0 sm:$0xff]  ;;  %v531_v26 = vld [vmem:[%s706_s5 + $0x30] sm:$0xff]   ;;  %v532_v27 = vld [vmem:[%s706_s5 + $0x38] sm:$0xff]  }
   0x6   :  { %449 = vmatmul.mubr.msk.bf16.vlgmr.msra.gmra.mrb[0].mxu1 %vm44_vm2, %v35_v5  ;;  %466 = vmatprep.subr.bf16.mxu0 %v545_v0  ;;  %v529_v24 = vld [vmem:[%s706_s5 + $0x20] sm:$0xff]   ;;  %v298_v39 = vld [vmem:[%s709_s7 + $0x8] sm:$0xff]  ;;  %v299_v41 = vld [vmem:[%s709_s7 + $0x10] sm:$0xff] }
   0x7   :  { %460 = vmatprep.mubr.msk.bf16.mxu1 %vm546_vm1, %v545_v0  ;;  %453 = vmatpush3.bf16.msra.mxu1 %v521_v6  ;;  %v402_v28 = vld [vmem:[%s708_s4] ss:$0 sm:$0xff]  ;;  %v300_v42 = vld [vmem:[%s709_s7 + $0x18] sm:$0xff]  ;;  %v302_v45 = vld [vmem:[%s709_s7 + $0x28] sm:$0xff] }
   0x8   :  { %454 = vmatprep.subr.bf16.mxu1 %v545_v0  ;;  %v297_v38 = vld [vmem:[%s709_s7] sm:$0xff]  ;;  %v507_v43 = vpack.c.bf16 %v300_v42, %v299_v41  ;;  %v303_v46 = vld [vmem:[%s709_s7 + $0x30] sm:$0xff]  ;;  %v304_v48 = vld [vmem:[%s709_s7 + $0x38] sm:$0xff] }
   0x9   :  { %467 = vmatpush3.bf16.msra.mxu0 %v526_v11  ;;  %v503_v40 = vpack.c.bf16 %v298_v39, %v297_v38  ;;  %v301_v44 = vld [vmem:[%s709_s7 + $0x20] sm:$0xff]  ;;  %v515_v49 = vpack.c.bf16 %v304_v48, %v303_v46 }
   0xa   :  { %468 = vmatprep.subr.bf16.mxu0 %v545_v0  ;;  %v511_v47 = vpack.c.bf16 %v302_v45, %v301_v44  ;;  %v408_v50 = vld [vmem:[%s710_s6] ss:$0 sm:$0xff] }
   0xb   :  { %455 = vmatpush3.bf16.msra.mxu1 %v522_v7  ;;  %v417_v59 = vld [vmem:[%s711_s8] ss:$0 sm:$0xff] }
   0xc   :  { %456 = vmatprep.subr.bf16.mxu1 %v545_v0 }
   0xd   :  { %469 = vmatpush3.bf16.msra.mxu0 %v527_v12 }
   0xe   :  { %470 = vmatprep.subr.bf16.mxu0 %v545_v0 }
   0xf   :  { %457 = vmatpush3.bf16.msra.mxu1 %v523_v8 }
  0x10   :  { %458 = vmatprep.subr.bf16.mxu1 %v545_v0 }
  0x11   :  { %471 = vmatpush3.bf16.msra.mxu0 %v528_v13 }
  0x12   :  { %472 = vmatprep.subr.bf16.mxu0 %v545_v0 }
  0x13   :  { %459 = vmatpush3.bf16.msra.mxu1 %v524_v9 }
  0x14   :  { %504 = vmatprep.subr.bf16.mxu1 %v503_v40 }
  0x15   :  { %473 = vmatpush3.bf16.msra.mxu0 %v529_v24 }
  0x16   :  { %474 = vmatprep.subr.bf16.mxu0 %v545_v0 }
  0x19   :  { %475 = vmatpush3.bf16.msra.mxu0 %v530_v25 }
  0x1a   :  { %476 = vmatprep.subr.bf16.mxu0 %v545_v0 }
  0x1d   :  { %477 = vmatpush3.bf16.msra.mxu0 %v531_v26 }
  0x1e   :  { %478 = vmatprep.subr.bf16.mxu0 %v545_v0 }
  0x21   :  { %479 = vmatpush3.bf16.msra.mxu0 %v532_v27 }
  0xd9   :  { %v86_v15 = vpop.f32.mrb[0].mxu1 }
  0xda   :  { %v87_v16 = vadd.f32 %v400_v14, %v86_v15  ;;  %v450_v17 = vpop.f32.mrb[1].mxu1 }
  0xdb   :  { %v89_v18 = vpop.f32.mrb[2].mxu1 }
  0xdc   :  { %v90_v19 = vadd.f32 %v400_v14, %v89_v18  ;;  %v451_v20 = vpop.f32.mrb[3].mxu1  ;;  %533 = vtanh.f32 %v87_v16 }
  0xde   :  { %535 = vtanh.f32 %v90_v19 }
  0xe6   :  { %v534_v21 = vpop.eup %533 }
  0xe8   :  { %v536_v22 = vpop.eup %535 }
  0xe9   :  { %v95_v23 = vpack.c.bf16 %v536_v22, %v534_v21 }
  0xeb   :  { %461 = vmatmul.mubr.msk.bf16.vlgmr.msra.gmra.mrb[4].mxu1 %vm135_vm3, %v95_v23 }
  0xec   :  { %506 = vmatpush3.bf16.msra.mxu1 %v503_v40 }
  0xed   :  { %508 = vmatprep.subr.bf16.mxu1 %v507_v43 }
  0xf0   :  { %510 = vmatpush3.bf16.msra.mxu1 %v507_v43 }
  0xf1   :  { %512 = vmatprep.subr.bf16.mxu1 %v511_v47 }
  0xf4   :  { %514 = vmatpush3.bf16.msra.mxu1 %v511_v47 }
  0xf5   :  { %516 = vmatprep.subr.bf16.mxu1 %v515_v49 }
  0xf8   :  { %518 = vmatpush3.bf16.msra.mxu1 %v515_v49 }
 0x1be   :  { %v173_v29 = vpop.f32.mrb[4].mxu1 }
 0x1bf   :  { %v174_v30 = vadd.f32 %v402_v28, %v173_v29  ;;  %v462_v31 = vpop.f32.mrb[5].mxu1 }
 0x1c0   :  { %v176_v32 = vpop.f32.mrb[6].mxu1 }
 0x1c1   :  { %v177_v33 = vadd.f32 %v402_v28, %v176_v32  ;;  %v463_v34 = vpop.f32.mrb[7].mxu1  ;;  %537 = vtanh.f32 %v174_v30 }
 0x1c3   :  { %539 = vtanh.f32 %v177_v33 }
 0x1cb   :  { %v538_v35 = vpop.eup %537 }
 0x1cd   :  { %v540_v36 = vpop.eup %539 }
 0x1ce   :  { %v182_v37 = vpack.c.bf16 %v540_v36, %v538_v35 }
 0x1d0   :  { %481 = vmatmul.mubr.bf16.vlgmr.msra.gmra.mrb[0].mxu0 %v182_v37 }
 0x2a3   :  { %v288_v51 = vpop.f32.mrb[0].mxu0 }
 0x2a4   :  { %v289_v52 = vadd.f32 %v408_v50, %v288_v51  ;;  %v482_v53 = vpop.f32.mrb[1].mxu0 }
 0x2a5   :  { %v291_v54 = vpop.f32.mrb[2].mxu0 }
 0x2a6   :  { %541 = vtanh.f32 %v289_v52  ;;  %v292_v55 = vadd.f32 %v408_v50, %v291_v54  ;;  %v483_v56 = vpop.f32.mrb[3].mxu0 }
 0x2a8   :  { %543 = vtanh.f32 %v292_v55 }
 0x2b0   :  { %v542_v57 = vpop.eup %541 }
 0x2b1   :  { %500 = vmatprep.mubr.msk.f32.mxu1 %vm135_vm3, %v542_v57 }
 0x2b2   :  { %v544_v58 = vpop.eup %543 }
 0x2b3   :  { %501 = vmatmul.mubr.msk.f32.vlgmr.msra.gmra.mrb[8].mxu1 %vm135_vm3, %v544_v58 }
 0x386   :  { %v502_v60 = vpop.f32.mrb[8].mxu1 }
 0x387   :  { %v390_v61 = vadd.f32 %v502_v60, %v417_v59  ;;  %v384_v62 = vpop.f32.mrb[9].mxu1 }
 0x388   :  { %v385_v63 = vadd.f32 %v417_v59, %v384_v62 }
 0x389   :  { %395 = vst.msk [vmem:[%s712_s9 + $0x8] sm:$0xff] %vm393_vm4, %v390_v61 }
 0x38a   :  { %394 = vst.msk [vmem:[%s712_s9] sm:$0xff] %vm393_vm4, %v385_v63 }

</bundles_post_ra>
